<compile_context>
chip_gen: v7x
topology: tpu7x:2x2x1
jax: 0.10.0
libtpu: 0.0.40
codegen_flags: <defaults>
</compile_context>

<pallas_src>
import jax
import jax.numpy as jnp
from jax.experimental import pallas as pl
from jax.experimental.pallas import tpu as pltpu


def _round_up(x, m):
    return (x + m - 1) // m * m


# ---------------------------------------------------------------------------
# Kernel 1: support = X @ W   (row-tiled over nodes; W resident per step)
# ---------------------------------------------------------------------------
def support_kernel(x_ref, w_ref, s_ref):
    s_ref[...] = jnp.dot(
        x_ref[...], w_ref[...], preferred_element_type=jnp.float32
    ).astype(s_ref.dtype)


# ---------------------------------------------------------------------------
# Kernel 2: out_tile = sum_k A[i,k] @ support[k] + bias
#           bf16 operands, f32 accumulation in VMEM scratch.
# ---------------------------------------------------------------------------
def aggregate_kernel(a_ref, s_ref, b_ref, o_ref, acc_ref):
    k = pl.program_id(1)

    @pl.when(k == 0)
    def _():
        acc_ref[...] = jnp.zeros_like(acc_ref)

    acc_ref[...] += jnp.dot(
        a_ref[...], s_ref[...], preferred_element_type=jnp.float32
    )

    @pl.when(k == pl.num_programs(1) - 1)
    def _():
        o_ref[...] = (acc_ref[...] + b_ref[...]).astype(o_ref.dtype)


def graph_convolution(adjacency, input_feature, weight, bias=None, *, tile=256):
    """JAX wrapper: output = A @ (X @ W) + bias.

    adjacency:     [N, N]        (dense stand-in for the sparse adjacency)
    input_feature: [N, in_dim]
    weight:        [in_dim, out_dim]
    bias:          [out_dim] or None
    returns:       [N, out_dim]  float32
    """
    N, in_dim = input_feature.shape
    out_dim = weight.shape[1]

    f32, bf16 = jnp.float32, jnp.bfloat16

    # Lane-dense output width (multiple of 128).  Single tile size `t` for
    # both the output-row axis and the contraction axis of A: either a
    # multiple of 128 (big graphs) or equal to the full padded dim (small
    # graphs), so every BlockSpec satisfies the (8,128) rule.
    out_p = _round_up(out_dim, 128)
    t = max(16, min(tile, _round_up(N, 16)))
    n_pad = _round_up(N, t)
    grid_rows = n_pad // t
    grid_k = n_pad // t

    # Zero-padded operands (padded A rows/cols and X rows contribute zeros).
    x_p = jnp.zeros((n_pad, in_dim), f32).at[:N, :].set(input_feature.astype(f32))
    w_p = jnp.zeros((in_dim, out_p), f32).at[:, :out_dim].set(weight.astype(f32))
    a_p = jnp.zeros((n_pad, n_pad), bf16).at[:N, :N].set(adjacency.astype(bf16))
    b_p = jnp.zeros((1, out_p), f32)
    if bias is not None:
        b_p = b_p.at[0, :out_dim].set(bias.astype(f32))

    # ---------------- support = X @ W (stored bf16 for the MXU pass) -------
    sup_vmem = (2 * t * in_dim * 4        # X tile (double-buffered, f32)
                + 2 * in_dim * out_p * 4  # W (constant index, 2 bufs)
                + 2 * t * out_p * 2)      # support output tile (bf16)
    support = pl.pallas_call(
        support_kernel,
        out_shape=jax.ShapeDtypeStruct((n_pad, out_p), bf16),
        grid_spec=pltpu.PrefetchScalarGridSpec(
            num_scalar_prefetch=0,
            grid=(grid_rows,),
            in_specs=[
                pl.BlockSpec((t, in_dim), lambda i: (i, 0)),      # X rows
                pl.BlockSpec((in_dim, out_p), lambda i: (0, 0)),  # W (full)
            ],
            out_specs=pl.BlockSpec((t, out_p), lambda i: (i, 0)),
        ),
        compiler_params=pltpu.CompilerParams(
            dimension_semantics=("parallel",),
            vmem_limit_bytes=int(min(64 << 20, sup_vmem + (4 << 20))),
        ),
    )(x_p, w_p)

    # ---------------- output = A @ support + bias (K-tiled accumulation) ---
    agg_vmem = (2 * t * t * 2             # A tile (bf16, 2 bufs)
                + 2 * t * out_p * 2       # support tile (bf16, 2 bufs)
                + 2 * out_p * 4           # bias
                + 2 * t * out_p * 4       # output tile (f32, 2 bufs)
                + t * out_p * 4)          # accumulator scratch
    out = pl.pallas_call(
        aggregate_kernel,
        out_shape=jax.ShapeDtypeStruct((n_pad, out_p), f32),
        grid_spec=pltpu.PrefetchScalarGridSpec(
            num_scalar_prefetch=0,
            grid=(grid_rows, grid_k),
            in_specs=[
                pl.BlockSpec((t, t), lambda i, k: (i, k)),        # A tile
                pl.BlockSpec((t, out_p), lambda i, k: (k, 0)),    # support tile
                pl.BlockSpec((1, out_p), lambda i, k: (0, 0)),    # bias
            ],
            out_specs=pl.BlockSpec((t, out_p), lambda i, k: (i, 0)),
            scratch_shapes=[pltpu.VMEM((t, out_p), jnp.float32)],
        ),
        compiler_params=pltpu.CompilerParams(
            dimension_semantics=("parallel", "arbitrary"),
            vmem_limit_bytes=int(min(64 << 20, agg_vmem + (4 << 20))),
        ),
    )(a_p, support, b_p)

    return out[:N, :out_dim]


def _init_params(key, input_dim, output_dim):
    """kaiming_uniform_ on a (input_dim, output_dim)-shaped weight: torch's
    fan_in = tensor.size(1) = output_dim for this module's storage layout."""
    fan_in = output_dim
    gain = 2.0 ** 0.5
    bound = gain * (3.0 / fan_in) ** 0.5
    weight = jax.random.uniform(
        key, (input_dim, output_dim), jnp.float32, minval=-bound, maxval=bound
    )
    bias = jnp.zeros((output_dim,), jnp.float32)
    return weight, bias


if __name__ == "__main__":
    # Small, deterministic shapes: 64 nodes, 32 input features, 16 outputs.
    N, IN_DIM, OUT_DIM = 64, 32, 16

    key = jax.random.PRNGKey(0)
    k_w, k_x, k_a = jax.random.split(key, 3)

    weight, bias = _init_params(k_w, IN_DIM, OUT_DIM)
    x = jax.random.normal(k_x, (N, IN_DIM), jnp.float32)

    # "Sparse-like" adjacency: random binary mask + self loops, row-normalized,
    # stored dense for the kernel.
    mask = (jax.random.uniform(k_a, (N, N)) < 0.1).astype(jnp.float32)
    adj = mask + jnp.eye(N, dtype=jnp.float32)
    adj = adj / jnp.sum(adj, axis=1, keepdims=True)

    out = graph_convolution(adj, x, weight, bias)
    out = jax.block_until_ready(out)

    # Reference in plain JAX (same semantics as the torch forward); bf16
    # adjacency/support in the kernel -> loosened tolerance vs f32 reference.
    ref = adj @ (x @ weight) + bias
    assert out.shape == (N, OUT_DIM)
    assert jnp.allclose(out, ref, atol=5e-2, rtol=5e-2)

    print("KERNEL_OK")
</pallas_src>

<mosaic_0001>
module attributes {stable_mosaic.version = 11 : i64} {
  func.func @support_kernel(%arg0: i32, %arg1: memref<64x32xf32, #tpu.memory_space<vmem>>, %arg2: memref<32x128xf32, #tpu.memory_space<vmem>>, %arg3: memref<64x128xbf16, #tpu.memory_space<vmem>>) attributes {dimension_semantics = [#tpu.dimension_semantics<parallel>], iteration_bounds = array<i64: 1>, scalar_prefetch = 0 : i64, scratch_operands = 0 : i64, tpu.core_type = #tpu.core_type<tc>, window_params = [{transform_indices = @transform_0, window_bounds = array<i64: 64, 32>}, {pipeline_mode = #tpu.pipeline_mode<synchronous>, transform_indices = @transform_1, window_bounds = array<i64: 32, 128>}, {transform_indices = @transform_2, window_bounds = array<i64: 64, 128>}]} {
    %c0 = arith.constant 0 : index
    %c0_0 = arith.constant 0 : index
    %0 = vector.load %arg1[%c0, %c0_0] : memref<64x32xf32, #tpu.memory_space<vmem>>, vector<64x32xf32>
    %c0_1 = arith.constant 0 : index
    %c0_2 = arith.constant 0 : index
    %1 = vector.load %arg2[%c0_1, %c0_2] : memref<32x128xf32, #tpu.memory_space<vmem>>, vector<32x128xf32>
    %cst = arith.constant dense<0.000000e+00> : vector<64x128xf32>
    %2 = tpu.matmul %0, %1, %cst {dimension_numbers = #tpu.dot_dimension_numbers<[1], [0], [0], [1], [0, 0, 1, 1], [], []>} : vector<64x32xf32>, vector<32x128xf32>, vector<64x128xf32> -> vector<64x128xf32>
    %3 = arith.truncf %2 : vector<64x128xf32> to vector<64x128xbf16>
    %c0_3 = arith.constant 0 : index
    %c0_4 = arith.constant 0 : index
    %4 = vector.load %arg3[%c0_3, %c0_4] : memref<64x128xbf16, #tpu.memory_space<vmem>>, vector<64x128xbf16>
    tpu.vector_store %arg3[%c0_3, %c0_4], %3 {strides = array<i32>} : memref<64x128xbf16, #tpu.memory_space<vmem>>, vector<64x128xbf16>,
    return
  }
  func.func @transform_0(%arg0: i32) -> (i32, i32) {
    %c0_i32 = arith.constant 0 : i32
    %c0_i32_0 = arith.constant 0 : i32
    return %arg0, %c0_i32 : i32, i32
  }
  func.func @transform_1(%arg0: i32) -> (i32, i32) {
    %c0_i32 = arith.constant 0 : i32
    %c0_i32_0 = arith.constant 0 : i32
    %c0_i32_1 = arith.constant 0 : i32
    return %c0_i32, %c0_i32_0 : i32, i32
  }
  func.func @transform_2(%arg0: i32) -> (i32, i32) {
    %c0_i32 = arith.constant 0 : i32
    %c0_i32_0 = arith.constant 0 : i32
    return %arg0, %c0_i32 : i32, i32
  }
}

</mosaic_0001>

<bundles_post_ra>
// kernel: tpu_custom_call.1
= control target key start
LH: loop header
LB: loop body
LE: loop exit
PB: predicated region body
PF: predicated region fallthrough
CT: control target
= control target key end

     0   :  { %vm24_vm0 = vcmask 261120   ;;  %s402_s0 = inlined_call_operand.vmem [shape: f32[64,32], index: 0, kind: input, shape index: {}]   ;;  %s403_s1 = inlined_call_operand.vmem [shape: f32[32,128], index: 1, kind: input, shape index: {}]   ;;  %s404_s2 = inlined_call_operand.hbm [shape: bf16[64,128], index: 2, kind: output, shape index: {}]  }
   0x1   :  { %v20_v0 = vld [vmem:[%s403_s1] sm:$0xff]  ;;  %v21_v1 = vld [vmem:[%s403_s1 + $0x8] sm:$0xff]  ;;  %v22_v2 = vld [vmem:[%s403_s1 + $0x10] sm:$0xff] }
   0x2   :  { %v289_v3 = vpack.c.bf16 %v21_v1, %v20_v0  ;;  %v23_v4 = vld [vmem:[%s403_s1 + $0x18] sm:$0xff]  ;;  %v12_v5 = vld [vmem:[%s402_s0] sm:$0xff] }
   0x3   :  { %v16_v6 = vld [vmem:[%s402_s0 + $0x20] sm:$0xff]  ;;  %v293_v7 = vpack.c.bf16 %v23_v4, %v22_v2  ;;  %277 = vmatprep.mubr.msk.f32.mxu0 %vm24_vm0, %v12_v5 }
   0x4   :  { %283 = vmatprep.mubr.msk.f32.mxu1 %vm24_vm0, %v16_v6  ;;  %290 = vmatprep.subr.bf16.mxu0 %v289_v3 }
   0x5   :  { %297 = vmatprep.subr.bf16.mxu1 %v289_v3  ;;  %292 = vmatpush3.bf16.msra.mxu0 %v289_v3 }
   0x6   :  { %299 = vmatpush3.bf16.msra.mxu1 %v289_v3 }
   0x7   :  { %7 = vsyncpa [#allocation3], 0  ;;  %294 = vmatprep.subr.bf16.mxu0 %v293_v7  ;;  %298 = vmatprep.subr.bf16.mxu1 %v293_v7  ;;  %v13_v8 = vld [vmem:[%s402_s0 + $0x8] sm:$0xff]  ;;  %v14_v10 = vld [vmem:[%s402_s0 + $0x10] sm:$0xff]  ;;  %s328_s4 = smov [#allocation2]  }
   0x8   :  { %v17_v9 = vld [vmem:[%s402_s0 + $0x28] sm:$0xff]  ;;  %v18_v11 = vld [vmem:[%s402_s0 + $0x30] sm:$0xff]  ;;  %v15_v12 = vld [vmem:[%s402_s0 + $0x18] sm:$0xff]  ;;  %s199_s5 = sshll.u32 %s328_s4, 4  ;;  %s200_s5 = int_to_ptr.vmem [resolvable:$true] %s199_s5 }
   0x9   :  { %296 = vmatpush3.bf16.msra.mxu0 %v293_v7  ;;  %v19_v13 = vld [vmem:[%s402_s0 + $0x38] sm:$0xff]  ;;  %s304_s0 = scalar_lea.vmem %s200_s5, 512  ;;  %p309_p1 = scmp.lt.s32.totalorder %s200_s5, %s200_s5 }
   0xa   :  { %300 = vmatpush3.bf16.msra.mxu1 %v293_v7  ;;  %p305_p0 = scmp.ne.s32.totalorder %s200_s5, %s304_s0  ;;  %p310_p2 = scmp.lt.s32.totalorder %s304_s0, %s304_s0 }
   0xc   :  { %278 = vmatmul.mubr.msk.f32.vlgmr.msra.gmra.mrb[0].mxu0 %vm24_vm0, %v13_v8  ;;  %p311_p3 = por %p310_p2, %p309_p1 }
   0xd   :  { %284 = vmatmul.mubr.msk.f32.vlgmr.msra.gmra.mrb[0].mxu1 %vm24_vm0, %v17_v9  ;;  %280 = vmatprep.mubr.msk.f32.mxu0 %vm24_vm0, %v14_v10 }
   0xe   :  { %286 = vmatprep.mubr.msk.f32.mxu1 %vm24_vm0, %v18_v11  ;;  %p312_p4 = pnand %p311_p3, %p305_p0 }
  0x10   :  { %281 = vmatmul.mubr.msk.f32.gmra.mrb[2].mxu0 %vm24_vm0, %v15_v12 }
  0x11   :  { %287 = vmatmul.mubr.msk.f32.gmra.mrb[2].mxu1 %vm24_vm0, %v19_v13 }
  0xdf   :  { %v279_v14 = vpop.f32.mrb[0].mxu0 }
  0xe0   :  { %v285_v15 = vpop.f32.mrb[0].mxu1  ;;  %v115_v16 = vpop.f32.mrb[1].mxu0 }
  0xe1   :  { %v135_v17 = vpop.f32.mrb[1].mxu1  ;;  %v237_v18 = vpack.c.bf16 %v279_v14, %v115_v16 }
  0xe2   :  { %v247_v19 = vpack.c.bf16 %v285_v15, %v135_v17 }
  0xe3   :  { %238 = vst [vmem:[#allocation2] sm:$0xff] %v237_v18   ;;  %v282_v20 = vpop.f32.mrb[2].mxu0 }
  0xe4   :  { %255 = vst [vmem:[#allocation2 + $0x10] sm:$0xff] %v247_v19   ;;  %v288_v21 = vpop.f32.mrb[2].mxu1  ;;  %v125_v22 = vpop.f32.mrb[3].mxu0 }
  0xe5   :  { %v145_v23 = vpop.f32.mrb[3].mxu1  ;;  %v242_v24 = vpack.c.bf16 %v282_v20, %v125_v22 }
  0xe6   :  { %v252_v25 = vpack.c.bf16 %v288_v21, %v145_v23 }
  0xe7   :  { %254 = vst [vmem:[#allocation2 + $0x8] sm:$0xff] %v242_v24  }
  0xe8   :  { %256 = vst [vmem:[#allocation2 + $0x18] sm:$0xff] %v252_v25  }
  0xe9   :  { %315 = shalt.err (!%p312_p4)
}
  0xea   :  { %s316_s8 = scalar_lea.hbm %s404_s2, 512 }
  0xeb   :  { %p317_p5 = scmp.ne.s32.totalorder %s404_s2, %s316_s8  ;;  %p320_p6 = scmp.lt.u32.totalorder %s316_s8, %s404_s2 }
  0xed   :  { %p322_p7 = pnand %p320_p6, %p317_p5 }
  0xef   :  { %325 = shalt.err (!%p322_p7)
}
  0xf0   :  { %s329_s13 = smov 64   ;;  %s330_s14 = smov 4  }
  0xf1   :  { %205 = dma.vmem_to_hbm [thread:$0]  %s200_s5, 512, %s404_s2, [#allocation3], %s329_s13, %s329_s13, %s330_s14  }
  0xf2   :  { %326 = dma.done.wait [#allocation3], 512  }
  0xf3   :  { %327 = vsyncadd [#allocation3], 4294966784 }
  0xf4   :  { %209 = vsyncpa [#allocation3], 1 }

</bundles_post_ra>
